<compile_context>
chip_gen: v5e
topology: v5e:2x2
jax: 0.10.0
libtpu: 0.0.40
codegen_flags: <defaults>
</compile_context>

<pallas_src>
import functools
import math

import jax
import jax.numpy as jnp
from jax import lax
from jax.experimental import pallas as pl
from jax.experimental.pallas import tpu as pltpu


def _fused_kernel(p_ref, w_ref, b_ref, g_ref, beta_ref, o_ref, *,
                  eps, negative_slope, inv_s):
    """patches (K,S), weight (Cout,K), bias/gamma/beta (Cout,1) -> out (Cout,S)."""
    p = p_ref[...]                                   # (K, S)
    w = w_ref[...]                                   # (Cout, K)

    # Conv as GEMM on the MXU, f32 accumulation, no transposed operand.
    conv = lax.dot_general(
        w, p,
        dimension_numbers=(((1,), (0,)), ((), ())),
        preferred_element_type=jnp.float32,
        precision=lax.Precision.HIGHEST)             # (Cout, S)
    conv = conv + b_ref[...].astype(jnp.float32)     # bias, broadcast (Cout,1)

    # InstanceNorm3d: per-channel biased mean / variance over the spatial axis.
    mean = jnp.sum(conv, axis=-1, keepdims=True) * inv_s
    cen = conv - mean
    var = jnp.sum(cen * cen, axis=-1, keepdims=True) * inv_s
    inv_std = lax.rsqrt(var + eps)                   # EUP slot, cheap
    y = cen * inv_std * g_ref[...].astype(jnp.float32) + beta_ref[...].astype(jnp.float32)

    # LeakyReLU(0.01).
    y = jnp.where(y >= 0, y, negative_slope * y)

    o_ref[...] = y.astype(o_ref.dtype)


def conv_dropout_norm_nonlin(x, weight, bias, gamma, beta, *,
                             eps=1e-5, negative_slope=0.01):
    """Fused Conv3d(3x3x3, stride 1, pad 1) + InstanceNorm3d(affine) + LeakyReLU.

    x:      (B, Cin, D, H, W)
    weight: (Cout, Cin, 3, 3, 3)   (PyTorch Conv3d layout)
    bias:   (Cout,)
    gamma:  (Cout,)   InstanceNorm3d weight
    beta:   (Cout,)   InstanceNorm3d bias
    """
    B, Cin, D, H, W = x.shape
    Cout, _, kd_, kh_, kw_ = weight.shape
    S = D * H * W
    K = Cin * kd_ * kh_ * kw_

    # ---- im2col in the wrapper (layout plumbing; stride=1, dilation=1, pad=1) ----
    xp = jnp.pad(x, ((0, 0), (0, 0), (1, 1), (1, 1), (1, 1)))
    cols = []
    for kd in range(kd_):
        for kh in range(kh_):
            for kw in range(kw_):
                cols.append(
                    lax.slice(xp, (0, 0, kd, kh, kw), (B, Cin, kd + D, kh + H, kw + W)))
    # (B, Cin, 27, D, H, W) -> (B, Cin*27, S); ordering matches weight.reshape below.
    patches = jnp.stack(cols, axis=2).reshape(B, K, S)

    w_mat = weight.reshape(Cout, K)
    b_col = bias.reshape(Cout, 1)
    g_col = gamma.reshape(Cout, 1)
    be_col = beta.reshape(Cout, 1)

    # Dropout3d(p=0) is the identity -> nothing to do.

    # VMEM budget: double-buffered (K,S) input and (Cout,S) output blocks + params.
    itemsize = jnp.dtype(patches.dtype).itemsize
    est = 2 * (K * S + Cout * S) * itemsize + (Cout * K + 3 * Cout) * 4 + (1 << 20)
    vmem_limit = int(min(max(est, 32 << 20), 100 << 20))

    kernel = functools.partial(
        _fused_kernel, eps=float(eps), negative_slope=float(negative_slope),
        inv_s=1.0 / float(S))

    out = pl.pallas_call(
        kernel,
        out_shape=jax.ShapeDtypeStruct((B, Cout, S), x.dtype),
        grid_spec=pltpu.PrefetchScalarGridSpec(
            num_scalar_prefetch=0,
            grid=(B,),
            in_specs=[
                pl.BlockSpec((pl.Squeezed(), K, S), lambda b: (b, 0, 0)),
                pl.BlockSpec((Cout, K), lambda b: (0, 0)),
                pl.BlockSpec((Cout, 1), lambda b: (0, 0)),
                pl.BlockSpec((Cout, 1), lambda b: (0, 0)),
                pl.BlockSpec((Cout, 1), lambda b: (0, 0)),
            ],
            out_specs=pl.BlockSpec((pl.Squeezed(), Cout, S), lambda b: (b, 0, 0)),
        ),
        compiler_params=pltpu.CompilerParams(
            dimension_semantics=("parallel",),
            vmem_limit_bytes=vmem_limit),
    )(patches, w_mat, b_col, g_col, be_col)

    return out.reshape(B, Cout, D, H, W)


def _reference(x, weight, bias, gamma, beta, eps=1e-5, negative_slope=0.01):
    conv = lax.conv_general_dilated(
        x, weight, window_strides=(1, 1, 1),
        padding=((1, 1), (1, 1), (1, 1)),
        dimension_numbers=("NCDHW", "OIDHW", "NCDHW"),
        precision=lax.Precision.HIGHEST)
    conv = conv + bias.reshape(1, -1, 1, 1, 1)
    mean = conv.mean(axis=(2, 3, 4), keepdims=True)
    var = conv.var(axis=(2, 3, 4), keepdims=True)      # biased, like InstanceNorm3d
    y = (conv - mean) / jnp.sqrt(var + eps)
    y = y * gamma.reshape(1, -1, 1, 1, 1) + beta.reshape(1, -1, 1, 1, 1)
    return jnp.where(y >= 0, y, negative_slope * y)


if __name__ == "__main__":
    key = jax.random.PRNGKey(0)
    B, Cin, Cout = 2, 4, 8
    D = H = W = 8

    k1, k2, k3, k4, k5 = jax.random.split(key, 5)
    x = jax.random.normal(k1, (B, Cin, D, H, W), dtype=jnp.float32)
    fan_in = Cin * 27
    weight = jax.random.normal(k2, (Cout, Cin, 3, 3, 3), dtype=jnp.float32) / math.sqrt(fan_in)
    bias = 0.1 * jax.random.normal(k3, (Cout,), dtype=jnp.float32)
    gamma = 1.0 + 0.1 * jax.random.normal(k4, (Cout,), dtype=jnp.float32)
    beta = 0.1 * jax.random.normal(k5, (Cout,), dtype=jnp.float32)

    out = conv_dropout_norm_nonlin(x, weight, bias, gamma, beta)
    out = jax.block_until_ready(out)

    ref = _reference(x, weight, bias, gamma, beta)
    assert out.shape == (B, Cout, D, H, W)
    assert jnp.allclose(out, ref, atol=1e-4, rtol=1e-4), \
        f"max abs err {jnp.max(jnp.abs(out - ref))}"

    print("KERNEL_OK")
</pallas_src>

<mosaic_0001>
module attributes {stable_mosaic.version = 11 : i64} {
  func.func @_fused_kernel(%arg0: i32, %arg1: memref<1x108x512xf32, #tpu.memory_space<vmem>>, %arg2: memref<8x108xf32, #tpu.memory_space<vmem>>, %arg3: memref<8x1xf32, #tpu.memory_space<vmem>>, %arg4: memref<8x1xf32, #tpu.memory_space<vmem>>, %arg5: memref<8x1xf32, #tpu.memory_space<vmem>>, %arg6: memref<1x8x512xf32, #tpu.memory_space<vmem>>) attributes {dimension_semantics = [#tpu.dimension_semantics<parallel>], iteration_bounds = array<i64: 2>, scalar_prefetch = 0 : i64, scratch_operands = 0 : i64, tpu.core_type = #tpu.core_type<tc>, window_params = [{transform_indices = @transform_0, window_bounds = array<i64: 1, 108, 512>}, {pipeline_mode = #tpu.pipeline_mode<synchronous>, transform_indices = @transform_1, window_bounds = array<i64: 8, 108>}, {pipeline_mode = #tpu.pipeline_mode<synchronous>, transform_indices = @transform_2, window_bounds = array<i64: 8, 1>}, {pipeline_mode = #tpu.pipeline_mode<synchronous>, transform_indices = @transform_3, window_bounds = array<i64: 8, 1>}, {pipeline_mode = #tpu.pipeline_mode<synchronous>, transform_indices = @transform_4, window_bounds = array<i64: 8, 1>}, {transform_indices = @transform_5, window_bounds = array<i64: 1, 8, 512>}]} {
    %c0 = arith.constant 0 : index
    %c0_0 = arith.constant 0 : index
    %c0_1 = arith.constant 0 : index
    %0 = vector.load %arg1[%c0, %c0_0, %c0_1] : memref<1x108x512xf32, #tpu.memory_space<vmem>>, vector<1x108x512xf32>
    %1 = vector.shape_cast %0 : vector<1x108x512xf32> to vector<108x512xf32>
    %c0_2 = arith.constant 0 : index
    %c0_3 = arith.constant 0 : index
    %2 = vector.load %arg2[%c0_2, %c0_3] : memref<8x108xf32, #tpu.memory_space<vmem>>, vector<8x108xf32>
    %cst = arith.constant dense<0.000000e+00> : vector<8x512xf32>
    %3 = tpu.matmul %2, %1, %cst {dimension_numbers = #tpu.dot_dimension_numbers<[1], [0], [0], [1], [0, 0, 1, 1], [], []>, precision = #tpu.contract_precision<fp32>} : vector<8x108xf32>, vector<108x512xf32>, vector<8x512xf32> -> vector<8x512xf32>
    %c0_4 = arith.constant 0 : index
    %c0_5 = arith.constant 0 : index
    %4 = vector.load %arg3[%c0_4, %c0_5] : memref<8x1xf32, #tpu.memory_space<vmem>>, vector<8x1xf32>
    %5 = vector.broadcast %4 : vector<8x1xf32> to vector<8x512xf32>
    %6 = arith.addf %3, %5 : vector<8x512xf32>
    %cst_6 = arith.constant dense<0.000000e+00> : vector<8xf32>
    %7 = vector.multi_reduction <add>, %6, %cst_6 [1] : vector<8x512xf32> to vector<8xf32>
    %8 = vector.shape_cast %7 : vector<8xf32> to vector<8x1xf32>
    %cst_7 = arith.constant 0.001953125 : f32
    %9 = vector.broadcast %cst_7 : f32 to vector<8x1xf32>
    %10 = arith.mulf %8, %9 : vector<8x1xf32>
    %11 = vector.broadcast %10 : vector<8x1xf32> to vector<8x512xf32>
    %12 = arith.subf %6, %11 : vector<8x512xf32>
    %13 = arith.mulf %12, %12 : vector<8x512xf32>
    %cst_8 = arith.constant dense<0.000000e+00> : vector<8xf32>
    %14 = vector.multi_reduction <add>, %13, %cst_8 [1] : vector<8x512xf32> to vector<8xf32>
    %15 = vector.shape_cast %14 : vector<8xf32> to vector<8x1xf32>
    %cst_9 = arith.constant 0.001953125 : f32
    %16 = vector.broadcast %cst_9 : f32 to vector<8x1xf32>
    %17 = arith.mulf %15, %16 : vector<8x1xf32>
    %cst_10 = arith.constant 9.99999974E-6 : f32
    %18 = vector.broadcast %cst_10 : f32 to vector<8x1xf32>
    %19 = arith.addf %17, %18 : vector<8x1xf32>
    %20 = math.rsqrt %19 : vector<8x1xf32>
    %21 = vector.broadcast %20 : vector<8x1xf32> to vector<8x512xf32>
    %22 = arith.mulf %12, %21 : vector<8x512xf32>
    %c0_11 = arith.constant 0 : index
    %c0_12 = arith.constant 0 : index
    %23 = vector.load %arg4[%c0_11, %c0_12] : memref<8x1xf32, #tpu.memory_space<vmem>>, vector<8x1xf32>
    %24 = vector.broadcast %23 : vector<8x1xf32> to vector<8x512xf32>
    %25 = arith.mulf %22, %24 : vector<8x512xf32>
    %c0_13 = arith.constant 0 : index
    %c0_14 = arith.constant 0 : index
    %26 = vector.load %arg5[%c0_13, %c0_14] : memref<8x1xf32, #tpu.memory_space<vmem>>, vector<8x1xf32>
    %27 = vector.broadcast %26 : vector<8x1xf32> to vector<8x512xf32>
    %28 = arith.addf %25, %27 : vector<8x512xf32>
    %cst_15 = arith.constant 0.000000e+00 : f32
    %29 = vector.broadcast %cst_15 : f32 to vector<8x512xf32>
    %30 = arith.cmpf oge, %28, %29 : vector<8x512xf32>
    %cst_16 = arith.constant 0.00999999977 : f32
    %31 = vector.broadcast %cst_16 : f32 to vector<8x512xf32>
    %32 = arith.mulf %31, %28 : vector<8x512xf32>
    %33 = arith.select %30, %28, %32 : vector<8x512xi1>, vector<8x512xf32>
    %c0_17 = arith.constant 0 : index
    %c0_18 = arith.constant 0 : index
    %c0_19 = arith.constant 0 : index
    %34 = vector.load %arg6[%c0_17, %c0_18, %c0_19] : memref<1x8x512xf32, #tpu.memory_space<vmem>>, vector<1x8x512xf32>
    %35 = vector.shape_cast %34 : vector<1x8x512xf32> to vector<8x512xf32>
    %36 = vector.shape_cast %33 : vector<8x512xf32> to vector<1x8x512xf32>
    tpu.vector_store %arg6[%c0_17, %c0_18, %c0_19], %36 {strides = array<i32>} : memref<1x8x512xf32, #tpu.memory_space<vmem>>, vector<1x8x512xf32>,
    return
  }
  func.func @transform_0(%arg0: i32) -> (i32, i32, i32) {
    %c0_i32 = arith.constant 0 : i32
    %c0_i32_0 = arith.constant 0 : i32
    %c0_i32_1 = arith.constant 0 : i32
    return %arg0, %c0_i32, %c0_i32_0 : i32, i32, i32
  }
  func.func @transform_1(%arg0: i32) -> (i32, i32) {
    %c0_i32 = arith.constant 0 : i32
    %c0_i32_0 = arith.constant 0 : i32
    %c0_i32_1 = arith.constant 0 : i32
    return %c0_i32, %c0_i32_0 : i32, i32
  }
  func.func @transform_2(%arg0: i32) -> (i32, i32) {
    %c0_i32 = arith.constant 0 : i32
    %c0_i32_0 = arith.constant 0 : i32
    %c0_i32_1 = arith.constant 0 : i32
    return %c0_i32, %c0_i32_0 : i32, i32
  }
  func.func @transform_3(%arg0: i32) -> (i32, i32) {
    %c0_i32 = arith.constant 0 : i32
    %c0_i32_0 = arith.constant 0 : i32
    %c0_i32_1 = arith.constant 0 : i32
    return %c0_i32, %c0_i32_0 : i32, i32
  }
  func.func @transform_4(%arg0: i32) -> (i32, i32) {
    %c0_i32 = arith.constant 0 : i32
    %c0_i32_0 = arith.constant 0 : i32
    %c0_i32_1 = arith.constant 0 : i32
    return %c0_i32, %c0_i32_0 : i32, i32
  }
  func.func @transform_5(%arg0: i32) -> (i32, i32, i32) {
    %c0_i32 = arith.constant 0 : i32
    %c0_i32_0 = arith.constant 0 : i32
    %c0_i32_1 = arith.constant 0 : i32
    return %arg0, %c0_i32, %c0_i32_0 : i32, i32, i32
  }
}

</mosaic_0001>

<bundles_post_ra>
// kernel: tpu_custom_call.1
= control target key start
LH: loop header
LB: loop body
LE: loop exit
PB: predicated region body
PF: predicated region fallthrough
CT: control target
= control target key end

     0   :  { %10 = vsyncpa [#allocation3], 0  ;;  %s2906_s0 = inlined_call_operand.vmem [shape: f32[2,108,512], index: 0, kind: input, shape index: {}]   ;;  %s2907_s1 = inlined_call_operand.vmem [shape: f32[8,108], index: 1, kind: input, shape index: {}]   ;;  %s2908_s2 = inlined_call_operand.vmem [shape: f32[8,1], index: 2, kind: input, shape index: {}]   ;;  %s2909_s3 = inlined_call_operand.vmem [shape: f32[8,1], index: 3, kind: input, shape index: {}]   ;;  %s2910_s4 = inlined_call_operand.vmem [shape: f32[8,1], index: 4, kind: input, shape index: {}]   ;;  %s2911_s5 = inlined_call_operand.hbm [shape: f32[2,8,512], index: 5, kind: output, shape index: {}]  }
   0x1   :  { %12 = vsyncpa [#allocation3 + $0x1], 0  ;;  %s1863_s18 = smov 0   ;;  %s1865_s19 = smov 0  }
   0x2   :  { %s1867_s20 = smov 0   ;;  %s1869_s21 = smov 0  }
   0x3 LB: > { %s1884_s22 = sadd.s32 4294967295, %s1830_s21   ;;  %s1710_s23 = sadd.s32 4294967294, %s1830_s21   ;;  %s1830_s21 = sphi %s1869_s21, %s2982_s21   ;;  %s1826_s20 = sphi %s1867_s20, %s2981_s20   ;;  %s1822_s19 = sphi %s1865_s19, %s2980_s19   ;;  %s1818_s18 = sphi %s1863_s18, %s2979_s18  }
   0x4   : > { %s1888_s24 = sadd.s32 1, %s1830_s21   ;;  %s135_s25 = sadd.s32 1, %s1826_s20 }
   0x5   : > { %s132_s26 = ssub.s32 %s1830_s21, %s1888_s24  ;;  %p145_p0 = scmp.ne.s32.totalorder %s1826_s20, %s1822_s19 }
   0x6   : > { %p133_p1 = scmp.eq.s32.totalorder %s132_s26, 0  ;;  %p146_p2 = scmp.eq.s32.totalorder %s1884_s22, 1 }
   0x7   : > { %p151_p3 = scmp.ne.s32.totalorder %s1822_s19, %s1818_s18  ;;  %p152_p4 = scmp.eq.s32.totalorder %s1710_s23, 1 }
   0x8   : > { %s1899_s27 = scalar_select %p133_p1, %s1826_s20, %s135_s25  }
   0x9   : > { %p1901_p5 = por %p146_p2, %p145_p0  ;;  %p1905_p6 = por %p152_p4, %p151_p3 }
   0xa   : > { %p1713_p7 = scmp.ge.s32.totalorder %s1830_s21, 1  ;;  %p190_p8 = scmp.lt.s32.totalorder %s1830_s21, 3 }
   0xc   : > { %p191_p9 = pnand %p1713_p7, %p190_p8 }
   0xd   : > { %p218_p10 = scmp.lt.s32.totalorder (!%p191_p9), %s1884_s22, 1  ;;  %s215_s23 = sand.u32 (!%p191_p9), 1, %s1822_s19  }
   0xe   : > { %194 = sbr.rel (%p191_p9) target bundleno = 629 (0x275), region = 40  ;;  %s1714_s25 = sshll.u32 (!%p191_p9), %s215_s23, 5 }
   0xf   : > { %s1721_s26 = sshll.u32 (!%p191_p9), %s1884_s22, 5  ;;  %s217_s8 = scalar_lea.vmem (!%p191_p9), [#allocation2], %s1714_s25 }
  0x10   : > { %s1646_s7 = scalar_lea.hbm (!%p191_p9), %s2911_s5, %s1721_s26  ;;  %s1635_s10 = scalar_lea.sflag (!%p191_p9), [#allocation3], %s215_s23 }
  0x11   : > { %s1788_s15 = scalar_lea.hbm (!%p191_p9), %s2911_s5, 64 }
  0x13   : > { %s219_s30 = scalar_select %p218_p10, %s1884_s22, 1  ;;  %vm290_vm0 = vcmask 1043456   ;;  %vm286_vm1 = vcmask 883712  }
  0x14   : > { %s1650_s22 = sshll.u32 %s1646_s7, 4  ;;  %s1651_s22 = int_to_ptr.hbm [resolvable:$true] %s1650_s22 }
  0x15   : > { %s1722_s6 = smul.u32 448, %s219_s30  ;;  %s1782_s11 = sshra.s32 %s1651_s22, 4  ;;  %s1783_s11 = int_to_ptr.hbm [resolvable:$true] %s1782_s11 }
  0x16   : > { %s1784_s12 = scalar_lea.hbm %s1783_s11, 32  ;;  %p1789_p0 = scmp.lt.s32.totalorder %s1783_s11, %s2911_s5 }
  0x17   : > { %s1916_s9 = scalar_lea.vmem %s2906_s0, %s1722_s6  ;;  %p1785_p11 = scmp.ne.s32.totalorder %s1783_s11, %s1784_s12 }
  0x18   : > { %v275_v0 = vld [vmem:[%s1916_s9 + $0x1a0] sm:$0xf]  ;;  %v276_v45 = vld [vmem:[%s1916_s9 + $0x1a8] sm:$0xf]  ;;  %p1790_p1 = scmp.lt.s32.totalorder %s1788_s15, %s1784_s12 }
  0x19   : > { %v271_v1 = vld [vmem:[%s1916_s9 + $0x180] sm:$0xff]  ;;  %v292_v3 = vsel %vm290_vm0, %v275_v0, 0  ;;  %v295_v55 = vsel %vm290_vm0, %v276_v45, 0  ;;  %v272_v56 = vld [vmem:[%s1916_s9 + $0x188] sm:$0xff]  ;;  %p1786_p12 = pnand %p1785_p11, %p1901_p5 }
  0x1a   : > { %v267_v2 = vld [vmem:[%s1916_s9 + $0x160] sm:$0xff]  ;;  %v1922_v4 = vand.u32 4294901760, %v271_v1  ;;  %v1929_v9 = vand.u32 4294901760, %v292_v3  ;;  %v2043_v63 = vand.u32 4294901760, %v295_v55  ;;  %v268_v0 = vld [vmem:[%s1916_s9 + $0x168] sm:$0xff]  ;;  %p1791_p2 = por %p1790_p1, %p1789_p0 }
  0x1b   : > { %v1924_v5 = vand.u32 4294901760, %v267_v2  ;;  %v263_v6 = vld [vmem:[%s1916_s9 + $0x140] sm:$0xff]  ;;  %p1787_p13 = pneg %p1786_p12 }
  0x1c   : > { %v259_v7 = vld [vmem:[%s1916_s9 + $0x120] sm:$0xff]  ;;  %v1931_v10 = vand.u32 4294901760, %v263_v6  ;;  %v1939_v14 = vsub.f32 %v271_v1, %v1922_v4  ;;  %306 = vmatpush.msra.mxu0 %v1929_v9  ;;  %v1949_v18 = vsub.f32 %v292_v3, %v1929_v9  ;;  %486 = vmatpush.msra.mxu3 %v1929_v9 }
  0x1d   : > { %v255_v8 = vld [vmem:[%s1916_s9 + $0x100] sm:$0xff]  ;;  %v1933_v11 = vand.u32 4294901760, %v259_v7  ;;  %v1942_v15 = vsub.f32 %v267_v2, %v1924_v5  ;;  %v2048_v2 = vand.u32 4294901760, %v272_v56  ;;  %p1792_p3 = pnand %p1791_p2, %p1787_p13 }
  0x1e   : > { %v1935_v12 = vand.u32 4294901760, %v255_v8  ;;  %v251_v13 = vld [vmem:[%s1916_s9 + $0xe0] sm:$0xff]  ;;  %v1953_v19 = vsub.f32 %v263_v6, %v1931_v10  ;;  %v352_v21 = vand.u32 4294901760, %v1939_v14  ;;  %308 = vmatpush.msra.mxu0 %v1922_v4  ;;  %437 = vmatpush.msra.mxu2 %v1949_v18  ;;  %v346_v25 = vand.u32 4294901760, %v1949_v18 }
  0x1f   : > { %v1944_v16 = vand.u32 4294901760, %v251_v13  ;;  %v247_v17 = vld [vmem:[%s1916_s9 + $0xc0] sm:$0xff]  ;;  %v1956_v20 = vsub.f32 %v259_v7, %v1933_v11  ;;  %v358_v22 = vand.u32 4294901760, %v1942_v15  ;;  %488 = vmatpush.msra.mxu3 %v1922_v4 }
  0x20   : > { %v1961_v23 = vsub.f32 %v255_v8, %v1935_v12  ;;  %v243_v24 = vld [vmem:[%s1916_s9 + $0xa0] sm:$0xff]  ;;  %v364_v26 = vand.u32 4294901760, %v1953_v19  ;;  %v1968_v27 = vand.u32 4294901760, %v247_v17  ;;  %v353_v28 = vsub.f32 %v1939_v14, %v352_v21  ;;  %310 = vmatpush.msra.mxu0 %v1924_v5  ;;  %440 = vmatpush.msra.mxu2 %v1939_v14 }
  0x21   : > { %v2923_v29 = vand.u32 4294901760, %v1956_v20  ;;  %v1976_v30 = vsub.f32 %v251_v13, %v1944_v16  ;;  %v239_v31 = vld [vmem:[%s1916_s9 + $0x80] sm:$0xff]  ;;  %v347_v32 = vsub.f32 %v1949_v18, %v346_v25  ;;  %v359_v33 = vsub.f32 %v1942_v15, %v358_v22  ;;  %490 = vmatpush.msra.mxu3 %v1924_v5  ;;  %v264_v13 = vld [vmem:[%s1916_s9 + $0x148] sm:$0xff] }
  0x22   : > { %v1987_v34 = vand.u32 4294901760, %v243_v24  ;;  %v365_v35 = vsub.f32 %v1953_v19, %v364_v26  ;;  %v2922_v36 = vand.u32 4294901760, %v1961_v23  ;;  %v235_v37 = vld [vmem:[%s1916_s9 + $0x60] sm:$0xff]  ;;  %312 = vmatpush.msra.mxu0 %v1931_v10  ;;  %443 = vmatpush.msra.mxu2 %v1942_v15  ;;  %v354_v39 = vand.u32 4294901760, %v353_v28 }
  0x23   : > { %v348_v38 = vand.u32 4294901760, %v347_v32  ;;  %v1998_v40 = vsub.f32 %v247_v17, %v1968_v27  ;;  %v2000_v41 = vand.u32 4294901760, %v239_v31  ;;  %492 = vmatpush.msra.mxu3 %v1931_v10  ;;  %v371_v42 = vsub.f32 %v1956_v20, %v2923_v29  ;;  %v231_v44 = vld [vmem:[%s1916_s9 + $0x40] sm:$0xff] }
  0x24   : > { %v2919_v43 = vand.u32 4294901760, %v1976_v30  ;;  %314 = vmatpush.msra.mxu0 %v1933_v11  ;;  %v360_v46 = vand.u32 4294901760, %v359_v33  ;;  %v2011_v47 = vsub.f32 %v243_v24, %v1987_v34  ;;  %v2013_v48 = vand.u32 4294901760, %v235_v37  ;;  %446 = vmatpush.msra.mxu2 %v1953_v19  ;;  %v227_v51 = vld [vmem:[%s1916_s9 + $0x20] sm:$0xff] }
  0x25   : > { %349 = vmatpush.msra.mxu1 %v348_v38  ;;  %v366_v49 = vand.u32 4294901760, %v365_v35  ;;  %494 = vmatpush.msra.mxu3 %v1933_v11  ;;  %v377_v50 = vsub.f32 %v1961_v23, %v2922_v36  ;;  %v2917_v52 = vand.u32 4294901760, %v1998_v40  ;;  %v2024_v53 = vsub.f32 %v239_v31, %v2000_v41  ;;  %v223_v59 = vld [vmem:[%s1916_s9] sm:$0xff]  ;;  %v260_v38 = vld [vmem:[%s1916_s9 + $0x128] sm:$0xff] }
  0x26   : > { %316 = vmatpush.msra.mxu0 %v1935_v12  ;;  %v2026_v54 = vand.u32 4294901760, %v231_v44  ;;  %449 = vmatpush.msra.mxu2 %v1956_v20  ;;  %v372_v57 = vand.u32 4294901760, %v371_v42  ;;  %v383_v58 = vsub.f32 %v1976_v30, %v2919_v43  ;;  %v2915_v60 = vand.u32 4294901760, %v2011_v47 }
  0x27   : > { %355 = vmatpush.msra.mxu1 %v354_v39  ;;  %496 = vmatpush.msra.mxu3 %v1935_v12  ;;  %v2039_v61 = vsub.f32 %v235_v37, %v2013_v48  ;;  %v2041_v62 = vand.u32 4294901760, %v227_v51  ;;  %v378_v1 = vand.u32 4294901760, %v377_v50  ;;  %v389_v3 = vsub.f32 %v1998_v40, %v2917_v52  ;;  %v256_v50 = vld [vmem:[%s1916_s9 + $0x108] sm:$0xff] }
  0x28   : > { %318 = vmatpush.msra.mxu0 %v1944_v16  ;;  %452 = vmatpush.msra.mxu2 %v1961_v23  ;;  %v2914_v6 = vand.u32 4294901760, %v2024_v53  ;;  %v2056_v7 = vsub.f32 %v231_v44, %v2026_v54  ;;  %v2058_v8 = vand.u32 4294901760, %v223_v59  ;;  %v2064_v17 = vsub.f32 %v295_v55, %v2043_v63  ;;  %v244_v52 = vld [vmem:[%s1916_s9 + $0xa8] sm:$0xff] }
  0x29   : > { %361 = vmatpush.msra.mxu1 %v360_v46  ;;  %498 = vmatpush.msra.mxu3 %v1944_v16  ;;  %v2066_v24 = vand.u32 4294901760, %v268_v0  ;;  %v384_v28 = vand.u32 4294901760, %v383_v58  ;;  %v395_v31 = vsub.f32 %v2011_v47, %v2915_v60  ;;  %v2912_v32 = vand.u32 4294901760, %v2039_v61  ;;  %v252_v58 = vld [vmem:[%s1916_s9 + $0xe8] sm:$0xff] }
  0x2a   : > { %320 = vmatpush.msra.mxu0 %v1968_v27  ;;  %455 = vmatpush.msra.mxu2 %v1976_v30  ;;  %v2074_v33 = vsub.f32 %v227_v51, %v2041_v62  ;;  %v2079_v35 = vsub.f32 %v272_v56, %v2048_v2  ;;  %v2081_v37 = vand.u32 4294901760, %v264_v13  ;;  %v390_v39 = vand.u32 4294901760, %v389_v3 }
  0x2b   : > { %367 = vmatpush.msra.mxu1 %v366_v49  ;;  %500 = vmatpush.msra.mxu3 %v1968_v27  ;;  %v401_v42 = vsub.f32 %v2024_v53, %v2914_v6  ;;  %v2913_v44 = vand.u32 4294901760, %v2056_v7  ;;  %v2090_v45 = vsub.f32 %v223_v59, %v2058_v8  ;;  %v2916_v46 = vand.u32 4294901760, %v2064_v17 }
  0x2c   : > { %322 = vmatpush.msra.mxu0 %v1987_v34  ;;  %458 = vmatpush.msra.mxu2 %v1998_v40  ;;  %v2096_v49 = vsub.f32 %v268_v0, %v2066_v24  ;;  %v396_v51 = vand.u32 4294901760, %v395_v31  ;;  %v407_v55 = vsub.f32 %v2039_v61, %v2912_v32  ;;  %v2918_v56 = vand.u32 4294901760, %v2074_v33  ;;  %v248_v32 = vld [vmem:[%s1916_s9 + $0xc8] sm:$0xff] }
  0x2d   : > { %373 = vmatpush.msra.mxu1 %v372_v57  ;;  %502 = vmatpush.msra.mxu3 %v1987_v34  ;;  %v2104_v57 = vand.u32 4294901760, %v260_v38  ;;  %v2920_v59 = vand.u32 4294901760, %v2079_v35  ;;  %v2111_v0 = vsub.f32 %v264_v13, %v2081_v37  ;;  %v413_v3 = vsub.f32 %v2056_v7, %v2913_v44 }
  0x2e   : > { %324 = vmatpush.msra.mxu0 %v2000_v41  ;;  %461 = vmatpush.msra.mxu2 %v2011_v47  ;;  %v2118_v31 = vand.u32 4294901760, %v256_v50  ;;  %v662_v13 = vsub.f32 %v2064_v17, %v2916_v46  ;;  %v408_v44 = vand.u32 4294901760, %v407_v55  ;;  %v419_v6 = vsub.f32 %v2074_v33, %v2918_v56 }
  0x2f   : > { %379 = vmatpush.msra.mxu1 %v378_v1  ;;  %504 = vmatpush.msra.mxu3 %v2000_v41  ;;  %v402_v1 = vand.u32 4294901760, %v401_v42  ;;  %v2126_v42 = vand.u32 4294901760, %v252_v58  ;;  %v2134_v60 = vsub.f32 %v260_v38, %v2104_v57  ;;  %v668_v46 = vsub.f32 %v2079_v35, %v2920_v59 }
  0x30   : > { %326 = vmatpush.msra.mxu0 %v2013_v48  ;;  %464 = vmatpush.msra.mxu2 %v2024_v53  ;;  %v414_v55 = vand.u32 4294901760, %v413_v3  ;;  %v2148_v56 = vsub.f32 %v256_v50, %v2118_v31  ;;  %v2150_v43 = vand.u32 4294901760, %v248_v32  ;;  %v663_v59 = vand.u32 4294901760, %v662_v13 }
  0x31   : > { %385 = vmatpush.msra.mxu1 %v384_v28  ;;  %506 = vmatpush.msra.mxu3 %v2013_v48  ;;  %v2921_v28 = vand.u32 4294901760, %v2090_v45  ;;  %v2159_v3 = vsub.f32 %v252_v58, %v2126_v42  ;;  %v420_v50 = vand.u32 4294901760, %v419_v6  ;;  %v685_v36 = vand.u32 4294901760, %v2134_v60  ;;  %v236_v58 = vld [vmem:[%s1916_s9 + $0x68] sm:$0xff]  ;;  %v279_v6 = vld [vmem:[%s2907_s1] sm:$0xff] }
  0x32   : > { %328 = vmatpush.msra.mxu0 %v2026_v54  ;;  %467 = vmatpush.msra.mxu2 %v2039_v61  ;;  %v2164_v29 = vand.u32 4294901760, %v244_v52  ;;  %v669_v18 = vand.u32 4294901760, %v668_v46  ;;  %v691_v13 = vand.u32 4294901760, %v2148_v56  ;;  %v2179_v14 = vsub.f32 %v248_v32, %v2150_v43 }
  0x33   : > { %391 = vmatpush.msra.mxu1 %v390_v39  ;;  %508 = vmatpush.msra.mxu3 %v2026_v54  ;;  %v2925_v39 = vand.u32 4294901760, %v2096_v49  ;;  %v425_v38 = vsub.f32 %v2090_v45, %v2921_v28  ;;  %v240_v28 = vld [vmem:[%s1916_s9 + $0x88] sm:$0xff]  ;;  %v288_v15 = vsel %vm286_vm1, %v279_v6, 0  ;;  %v2947_v19 = vand.u32 4294901760, %v1956_v20 }
  0x34   : > { %330 = vmatpush.msra.mxu0 %v2041_v62  ;;  %470 = vmatpush.msra.mxu2 %v2056_v7  ;;  %v2192_v32 = vsub.f32 %v244_v52, %v2164_v29  ;;  %v228_v6 = vld [vmem:[%s1916_s9 + $0x28] sm:$0xff] }
  0x35   : > { %397 = vmatpush.msra.mxu1 %v396_v51  ;;  %510 = vmatpush.msra.mxu3 %v2041_v62  ;;  %v2924_v51 = vand.u32 4294901760, %v2111_v0  ;;  %v2226_v20 = vand.u32 4294901760, %v228_v6 }
  0x36   : > { %332 = vmatpush.msra.mxu0 %v2058_v8  ;;  %473 = vmatpush.msra.mxu2 %v2074_v33 }
  0x37   : > { %403 = vmatpush.msra.mxu1 %v402_v1  ;;  %v674_v1 = vsub.f32 %v2096_v49, %v2925_v39  ;;  %512 = vmatpush.msra.mxu3 %v2058_v8  ;;  %v232_v39 = vld [vmem:[%s1916_s9 + $0x48] sm:$0xff] }
  0x38   : > { %525 = vmatpush.msrb.mxu0 %v346_v25  ;;  %476 = vmatpush.msra.mxu2 %v2090_v45  ;;  %v680_v25 = vsub.f32 %v2111_v0, %v2924_v51  ;;  %v2926_v51 = vand.u32 4294901760, %v2159_v3 }
  0x39   : > { %409 = vmatpush.msra.mxu1 %v408_v44  ;;  %v426_v44 = vand.u32 4294901760, %v425_v38  ;;  %664 = vmatpush.msrb.mxu3 %v663_v59  ;;  %v675_v46 = vand.u32 4294901760, %v674_v1  ;;  %v2194_v38 = vand.u32 4294901760, %v236_v58  ;;  %v692_v59 = vsub.f32 %v2148_v56, %v691_v13 }
  0x3a   : > { %529 = vmatpush.msrb.mxu0 %v352_v21  ;;  %621 = vmatpush.msrb.mxu2 %v2043_v63  ;;  %v2181_v21 = vand.u32 4294901760, %v240_v28  ;;  %v703_v1 = vand.u32 4294901760, %v2179_v14 }
  0x3b   : > { %415 = vmatpush.msra.mxu1 %v414_v55  ;;  %v686_v55 = vsub.f32 %v2134_v60, %v685_v36  ;;  %670 = vmatpush.msrb.mxu3 %v669_v18 }
  0x3c   : > { %533 = vmatpush.msrb.mxu0 %v358_v22  ;;  %623 = vmatpush.msrb.mxu2 %v2048_v2  ;;  %v681_v22 = vand.u32 4294901760, %v680_v25  ;;  %v2205_v52 = vsub.f32 %v240_v28, %v2181_v21  ;;  %v698_v25 = vsub.f32 %v2159_v3, %v2926_v51  ;;  %v709_v28 = vand.u32 4294901760, %v2192_v32 }
  0x3d   : > { %421 = vmatpush.msra.mxu1 %v420_v50  ;;  %v2207_v50 = vand.u32 4294901760, %v232_v39  ;;  %676 = vmatpush.msrb.mxu3 %v675_v46  ;;  %v687_v18 = vand.u32 4294901760, %v686_v55  ;;  %v693_v46 = vand.u32 4294901760, %v692_v59  ;;  %v704_v55 = vsub.f32 %v2179_v14, %v703_v1 }
  0x3e   : > { %537 = vmatpush.msrb.mxu0 %v364_v26  ;;  %625 = vmatpush.msrb.mxu2 %v2066_v24  ;;  %v2213_v26 = vand.u32 4294901760, %v288_v15  ;;  %v715_v51 = vand.u32 4294901760, %v2205_v52  ;;  %v710_v59 = vsub.f32 %v2192_v32, %v709_v28 }
  0x3f   : > { %427 = vmatpush.msra.mxu1 %v426_v44  ;;  %v2221_v44 = vsub.f32 %v236_v58, %v2194_v38  ;;  %682 = vmatpush.msrb.mxu3 %v681_v22  ;;  %v2235_v58 = vsub.f32 %v232_v39, %v2207_v50  ;;  %v699_v22 = vand.u32 4294901760, %v698_v25 }
  0x40   : > { %541 = vmatpush.msrb.mxu0 %v2947_v19  ;;  %627 = vmatpush.msrb.mxu2 %v2081_v37  ;;  %v224_v19 = vld [vmem:[%s1916_s9 + $0x8] sm:$0xff] }
  0x41   : > { %586 = vmatpush.msrb.mxu1 %v1929_v9  ;;  %v2948_v9 = vand.u32 4294901760, %v1961_v23  ;;  %v2241_v23 = vsub.f32 %v288_v15, %v2213_v26  ;;  %688 = vmatpush.msrb.mxu3 %v687_v18  ;;  %v2248_v39 = vand.u32 4294901760, %v224_v19  ;;  %v705_v15 = vand.u32 4294901760, %v704_v55 }
  0x42   : > { %629 = vmatpush.msrb.mxu2 %v2104_v57  ;;  %v716_v18 = vsub.f32 %v2205_v52, %v715_v51  ;;  %v727_v25 = vand.u32 4294901760, %v2235_v58  ;;  %429 = vmatmul.f32.vlgmr.msra.gmra.mxu1 %v2213_v26 }
  0x43   : > { %588 = vmatpush.msrb.mxu1 %v1922_v4  ;;  %545 = vmatpush.msrb.mxu0 %v2948_v9  ;;  %v2949_v4 = vand.u32 4294901760, %v1976_v30  ;;  %v721_v9 = vand.u32 4294901760, %v2221_v44  ;;  %v2254_v30 = vsub.f32 %v228_v6, %v2226_v20  ;;  %v711_v6 = vand.u32 4294901760, %v710_v59 }
  0x44   : > { %631 = vmatpush.msrb.mxu2 %v2118_v31  ;;  %694 = vmatpush.msrb.mxu3 %v693_v46  ;;  %v2272_v55 = vsub.f32 %v224_v19, %v2248_v39  ;;  %v2953_v19 = vand.u32 4294901760, %v2039_v61 }
  0x45   : > { %590 = vmatpush.msrb.mxu1 %v1924_v5  ;;  %549 = vmatpush.msrb.mxu0 %v2949_v4  ;;  %v2950_v5 = vand.u32 4294901760, %v1998_v40  ;;  %v2265_v40 = vand.u32 4294901760, %v2241_v23  ;;  %v722_v46 = vsub.f32 %v2221_v44, %v721_v9  ;;  %v717_v4 = vand.u32 4294901760, %v716_v18 }
  0x46   : > { %633 = vmatpush.msrb.mxu2 %v2126_v42  ;;  %700 = vmatpush.msrb.mxu3 %v699_v22  ;;  %v728_v22 = vsub.f32 %v2235_v58, %v727_v25  ;;  %v739_v59 = vand.u32 4294901760, %v2272_v55 }
  0x47   : > { %592 = vmatpush.msrb.mxu1 %v1931_v10  ;;  %553 = vmatpush.msrb.mxu0 %v2950_v5  ;;  %v2951_v10 = vand.u32 4294901760, %v2011_v47  ;;  %v733_v47 = vand.u32 4294901760, %v2254_v30  ;;  %v2954_v5 = vand.u32 4294901760, %v2056_v7  ;;  %v2956_v7 = vand.u32 4294901760, %v2090_v45 }
  0x48   : > { %635 = vmatpush.msrb.mxu2 %v2150_v43  ;;  %706 = vmatpush.msrb.mxu3 %v705_v15  ;;  %v729_v61 = vand.u32 4294901760, %v728_v22  ;;  %v2955_v15 = vand.u32 4294901760, %v2074_v33  ;;  %v269_v33 = vld [vmem:[%s1916_s9 + $0x170] sm:$0xff] }
  0x49   : > { %594 = vmatpush.msrb.mxu1 %v1933_v11  ;;  %557 = vmatpush.msrb.mxu0 %v2951_v10  ;;  %v2952_v11 = vand.u32 4294901760, %v2024_v53  ;;  %v723_v53 = vand.u32 4294901760, %v722_v46 }
  0x4a   : > { %637 = vmatpush.msrb.mxu2 %v2164_v29  ;;  %712 = vmatpush.msrb.mxu3 %v711_v6 }
  0x4b   : > { %596 = vmatpush.msrb.mxu1 %v1935_v12  ;;  %561 = vmatpush.msrb.mxu0 %v2952_v11  ;;  %v336_v12 = vsub.f32 %v2241_v23, %v2265_v40 }
  0x4c   : > { %639 = vmatpush.msrb.mxu2 %v2181_v21  ;;  %718 = vmatpush.msrb.mxu3 %v717_v4  ;;  %v237_v4 = vld [vmem:[%s1916_s9 + $0x70] sm:$0xff] }
  0x4d   : > { %598 = vmatpush.msrb.mxu1 %v1944_v16  ;;  %565 = vmatpush.msrb.mxu0 %v2953_v19  ;;  %v734_v16 = vsub.f32 %v2254_v30, %v733_v47  ;;  %v2299_v18 = vand.u32 4294901760, %v336_v12 }
  0x4e   : > { %641 = vmatpush.msrb.mxu2 %v2194_v38  ;;  %724 = vmatpush.msrb.mxu3 %v723_v53 }
  0x4f   : > { %600 = vmatpush.msrb.mxu1 %v1968_v27  ;;  %569 = vmatpush.msrb.mxu0 %v2954_v5  ;;  %v740_v27 = vsub.f32 %v2272_v55, %v739_v59  ;;  %v735_v10 = vand.u32 4294901760, %v734_v16 }
  0x50   : > { %643 = vmatpush.msrb.mxu2 %v2207_v50  ;;  %730 = vmatpush.msrb.mxu3 %v729_v61  ;;  %v2490_v61 = vand.u32 4294901760, %v237_v4 }
  0x51   : > { %602 = vmatpush.msrb.mxu1 %v1987_v34  ;;  %573 = vmatpush.msrb.mxu0 %v2955_v15  ;;  %v741_v34 = vand.u32 4294901760, %v740_v27  ;;  %v278_v15 = vld [vmem:[%s1916_s9 + $0x1b8] sm:$0xf] }
  0x52   : > { %645 = vmatpush.msrb.mxu2 %v2226_v20  ;;  %338 = vmatmul.f32.vlgmr.msra.gmra.mxu0 %v2299_v18 }
  0x53   : > { %604 = vmatpush.msrb.mxu1 %v2000_v41  ;;  %577 = vmatpush.msrb.mxu0 %v2956_v7  ;;  %v2957_v41 = vand.u32 4294901760, %v2064_v17 }
  0x54   : > { %647 = vmatpush.msrb.mxu2 %v2248_v39  ;;  %736 = vmatpush.msrb.mxu3 %v735_v10  ;;  %v229_v10 = vld [vmem:[%s1916_s9 + $0x30] sm:$0xff] }
  0x55   : > { %606 = vmatpush.msrb.mxu1 %v2013_v48  ;;  %752 = vmatpush.msra.mxu0 %v2064_v17  ;;  %v2958_v48 = vand.u32 4294901760, %v2079_v35  ;;  %v273_v17 = vld [vmem:[%s1916_s9 + $0x190] sm:$0xff] }
  0x56   : > { %479 = vmatmul.f32.vlgmr.msra.gmra.mxu2 %v2241_v23  ;;  %742 = vmatpush.msrb.mxu3 %v741_v34 }
  0x57   : > { %608 = vmatpush.msrb.mxu1 %v2026_v54  ;;  %755 = vmatpush.msra.mxu0 %v2079_v35  ;;  %v2959_v54 = vand.u32 4294901760, %v2096_v49  ;;  %v2374_v35 = vand.u32 4294901760, %v273_v17 }
  0x58   : > { %840 = vmatpush.msra.mxu2 %v2957_v41  ;;  %516 = vmatmul.f32.vlgmr.msra.gmra.mxu3 %v2265_v40 }
  0x59   : > { %610 = vmatpush.msrb.mxu1 %v2041_v62  ;;  %758 = vmatpush.msra.mxu0 %v2096_v49  ;;  %v2960_v62 = vand.u32 4294901760, %v2111_v0  ;;  %v2385_v49 = vand.u32 4294901760, %v269_v33 }
  0x5a   : > { %844 = vmatpush.msra.mxu2 %v2958_v48  ;;  %901 = vmatpush.msra.mxu3 %v2043_v63 }
  0x5b   : > { %612 = vmatpush.msrb.mxu1 %v2058_v8  ;;  %761 = vmatpush.msra.mxu0 %v2111_v0  ;;  %v257_v0 = vld [vmem:[%s1916_s9 + $0x110] sm:$0xff] }
  0x5c   : > { %848 = vmatpush.msra.mxu2 %v2959_v54  ;;  %903 = vmatpush.msra.mxu3 %v2048_v2 }
  0x5d   : > { %801 = vmatpush.msra.mxu1 %v2043_v63  ;;  %764 = vmatpush.msra.mxu0 %v2134_v60  ;;  %v277_v63 = vld [vmem:[%s1916_s9 + $0x1b0] sm:$0xf]  ;;  %v2961_v60 = vand.u32 4294901760, %v2159_v3 }
  0x5e   : > { %852 = vmatpush.msra.mxu2 %v2960_v62  ;;  %905 = vmatpush.msra.mxu3 %v2066_v24  ;;  %v298_v8 = vsel %vm290_vm0, %v277_v63, 0  ;;  %v225_v62 = vld [vmem:[%s1916_s9 + $0x10] sm:$0xff]  ;;  %v301_v63 = vsel %vm290_vm0, %v278_v15, 0  ;;  %v266_v15 = vld [vmem:[%s1916_s9 + $0x158] sm:$0xff] }
  0x5f   : > { %803 = vmatpush.msra.mxu1 %v2048_v2  ;;  %767 = vmatpush.msra.mxu0 %v2148_v56  ;;  %v2927_v2 = vmov 0   ;;  %v261_v56 = vld [vmem:[%s1916_s9 + $0x130] sm:$0xff] }
  0x60   : > { %856 = vmatpush.msra.mxu2 %v685_v36  ;;  %907 = vmatpush.msra.mxu3 %v2081_v37  ;;  %v280_v36 = vld [vmem:[%s2908_s2] sm:$0xff] }
  0x61   : > { %805 = vmatpush.msra.mxu1 %v2066_v24  ;;  %579 = vmatmul.f32.vlgmr.msrb.gmra.mxu0 %v2213_v26  ;;  %v2366_v24 = vand.u32 4294901760, %v298_v8 }
  0x62   : > { %770 = vmatpush.msra.mxu0 %v2159_v3  ;;  %860 = vmatpush.msra.mxu2 %v691_v13  ;;  %v2413_v3 = vand.u32 4294901760, %v257_v0 }
  0x63   : > { %807 = vmatpush.msra.mxu1 %v2081_v37  ;;  %909 = vmatpush.msra.mxu3 %v2104_v57  ;;  %v265_v37 = vld [vmem:[%s1916_s9 + $0x150] sm:$0xff]  ;;  %v2383_v45 = vsub.f32 %v298_v8, %v2366_v24  ;;  %v2516_v8 = vsub.f32 %v237_v4, %v2490_v61  ;;  %v270_v4 = vld [vmem:[%s1916_s9 + $0x178] sm:$0xff] }
  0x64   : > { %1763 = vset.pattern.permute.xlu0 %v2927_v2  ;;  %614 = vmatmul.f32.vlgmr.msrb.gmra.mxu1 %v2213_v26 }
  0x65   : > { %773 = vmatpush.msra.mxu0 %v2179_v14  ;;  %809 = vmatpush.msra.mxu1 %v2104_v57  ;;  %v2396_v57 = vand.u32 4294901760, %v265_v37 }
  0x66   : > { %864 = vmatpush.msra.mxu2 %v2961_v60  ;;  %911 = vmatpush.msra.mxu3 %v2118_v31 }
  0x67   : > { %283 = vperm.xlu0 %1763, %v280_v36   ;;  %776 = vmatpush.msra.mxu0 %v2192_v32  ;;  %v2420_v14 = vsub.f32 %v265_v37, %v2396_v57 }
  0x68   : > { %811 = vmatpush.msra.mxu1 %v2118_v31  ;;  %868 = vmatpush.msra.mxu2 %v703_v1  ;;  %v2406_v31 = vsub.f32 %v269_v33, %v2385_v49 }
  0x69   : > { %913 = vmatpush.msra.mxu3 %v2126_v42  ;;  %779 = vmatpush.msra.mxu0 %v2205_v52 }
  0x6a   : > { %813 = vmatpush.msra.mxu1 %v2126_v42  ;;  %872 = vmatpush.msra.mxu2 %v709_v28  ;;  %v2408_v42 = vand.u32 4294901760, %v261_v56  ;;  %v988_v1 = vand.u32 4294901760, %v2406_v31  ;;  %v2440_v28 = vsub.f32 %v257_v0, %v2413_v3 }
  0x6b   : > { %915 = vmatpush.msra.mxu3 %v2150_v43  ;;  %782 = vmatpush.msra.mxu0 %v2221_v44  ;;  %v245_v44 = vld [vmem:[%s1916_s9 + $0xb0] sm:$0xff] }
  0x6c   : > { %815 = vmatpush.msra.mxu1 %v2150_v43  ;;  %876 = vmatpush.msra.mxu2 %v715_v51  ;;  %v2394_v43 = vsub.f32 %v273_v17, %v2374_v35  ;;  %v253_v51 = vld [vmem:[%s1916_s9 + $0xf0] sm:$0xff]  ;;  %v2435_v52 = vsub.f32 %v261_v56, %v2408_v42  ;;  %v989_v46 = vsub.f32 %v2406_v31, %v988_v1  ;;  %v2463_v11 = vand.u32 4294901760, %v245_v44  ;;  %v274_v56 = vld [vmem:[%s1916_s9 + $0x198] sm:$0xff] }
  0x6d   : > { %917 = vmatpush.msra.mxu3 %v2164_v29  ;;  %653 = vmatmul.f32.vlgmr.msrb.gmra.mxu2 %v2299_v18  ;;  %v2425_v32 = vand.u32 4294901760, %v253_v51  ;;  %v2518_v17 = vand.u32 4294901760, %v229_v10 }
  0x6e   : > { %785 = vmatpush.msra.mxu0 %v2235_v58  ;;  %817 = vmatpush.msra.mxu1 %v2164_v29  ;;  %v976_v29 = vand.u32 4294901760, %v2383_v45  ;;  %v982_v13 = vand.u32 4294901760, %v2394_v43  ;;  %v990_v5 = vand.u32 4294901760, %v989_v46  ;;  %v2488_v16 = vsub.f32 %v245_v44, %v2463_v11 }
  0x6f   : > { %880 = vmatpush.msra.mxu2 %v721_v9  ;;  %919 = vmatpush.msra.mxu3 %v2181_v21  ;;  %v2940_v9 = vand.u32 4294901760, %v2420_v14  ;;  %v2545_v46 = vand.u32 4294901760, %v274_v56 }
  0x70   : > { %744 = vmatmul.f32.vlgmr.msrb.gmra.mxu3 %v2213_v26  ;;  %788 = vmatpush.msra.mxu0 %v2254_v30  ;;  %v983_v58 = vsub.f32 %v2394_v43, %v982_v13  ;;  %v2454_v30 = vsub.f32 %v253_v51, %v2425_v32  ;;  %v2932_v60 = vand.u32 4294901760, %v2488_v16 }
  0x71   : > { %819 = vmatpush.msra.mxu1 %v2181_v21  ;;  %884 = vmatpush.msra.mxu2 %v727_v25  ;;  %v249_v21 = vld [vmem:[%s1916_s9 + $0xd0] sm:$0xff]  ;;  %v995_v19 = vsub.f32 %v2420_v14, %v2940_v9  ;;  %v242_v9 = vld [vmem:[%s1916_s9 + $0x98] sm:$0xff] }
  0x72   : > { %921 = vmatpush.msra.mxu3 %v2194_v38  ;;  %791 = vmatpush.msra.mxu0 %v2272_v55  ;;  %v241_v25 = vld [vmem:[%s1916_s9 + $0x90] sm:$0xff]  ;;  %v2939_v55 = vand.u32 4294901760, %v2435_v52  ;;  %v984_v22 = vand.u32 4294901760, %v983_v58  ;;  %v2937_v53 = vand.u32 4294901760, %v2454_v30  ;;  %v1025_v58 = vsub.f32 %v2488_v16, %v2932_v60 }
  0x73   : > { %821 = vmatpush.msra.mxu1 %v2194_v38  ;;  %888 = vmatpush.msra.mxu2 %v733_v47  ;;  %v977_v38 = vsub.f32 %v2383_v45, %v976_v29  ;;  %v2477_v12 = vand.u32 4294901760, %v241_v25  ;;  %v996_v34 = vand.u32 4294901760, %v995_v19 }
  0x74   : > { %923 = vmatpush.msra.mxu3 %v2207_v50  ;;  %936 = vmatpush.msrb.mxu0 %v2366_v24  ;;  %v1013_v54 = vsub.f32 %v2454_v30, %v2937_v53  ;;  %v246_v53 = vld [vmem:[%s1916_s9 + $0xb8] sm:$0xff] }
  0x75   : > { %823 = vmatpush.msra.mxu1 %v2207_v50  ;;  %892 = vmatpush.msra.mxu2 %v739_v59  ;;  %v2442_v50 = vand.u32 4294901760, %v249_v21  ;;  %v978_v6 = vand.u32 4294901760, %v977_v38  ;;  %v233_v59 = vld [vmem:[%s1916_s9 + $0x50] sm:$0xff]  ;;  %v2502_v41 = vsub.f32 %v241_v25, %v2477_v12  ;;  %v2533_v38 = vand.u32 4294901760, %v301_v63 }
  0x76   : > { %925 = vmatpush.msra.mxu3 %v2226_v20  ;;  %894 = vmatmul.f32.vlgmr.msra.gmra.mxu2 %v2213_v26  ;;  %v2504_v48 = vand.u32 4294901760, %v233_v59  ;;  %v1014_v44 = vand.u32 4294901760, %v1013_v54  ;;  %v2930_v25 = vand.u32 4294901760, %v2516_v8 }
  0x77   : > { %938 = vmatpush.msrb.mxu0 %v2374_v35  ;;  %1067 = vmatpush.msrb.mxu2 %v2383_v45  ;;  %v2469_v47 = vsub.f32 %v249_v21, %v2442_v50  ;;  %v2931_v0 = vand.u32 4294901760, %v2502_v41  ;;  %v2531_v21 = vand.u32 4294901760, %v225_v62 }
  0x78   : > { %825 = vmatpush.msra.mxu1 %v2226_v20  ;;  %927 = vmatpush.msra.mxu3 %v2248_v39  ;;  %v2938_v20 = vand.u32 4294901760, %v2440_v28  ;;  %v2529_v51 = vsub.f32 %v233_v59, %v2504_v48 }
  0x79   : > { %794 = vmatmul.f32.vlgmr.msra.gmra.mxu0 %v2241_v23  ;;  %929 = vmatmul.f32.vlgmr.msra.gmra.mxu3 %v2213_v26  ;;  %v2934_v7 = vand.u32 4294901760, %v2469_v47  ;;  %v1031_v19 = vsub.f32 %v2502_v41, %v2931_v0  ;;  %v254_v0 = vld [vmem:[%s1916_s9 + $0xf8] sm:$0xff] }
  0x7a   : > { %940 = vmatpush.msrb.mxu0 %v2385_v49  ;;  %1070 = vmatpush.msrb.mxu2 %v2394_v43  ;;  %v1007_v27 = vsub.f32 %v2440_v28, %v2938_v20  ;;  %v2929_v59 = vand.u32 4294901760, %v2529_v51 }
  0x7b   : > { %1116 = vmatpush.msrb.mxu3 %v2366_v24  ;;  %827 = vmatpush.msra.mxu1 %v2248_v39  ;;  %v1001_v39 = vsub.f32 %v2435_v52, %v2939_v55  ;;  %v1019_v37 = vsub.f32 %v2469_v47, %v2934_v7  ;;  %v250_v7 = vld [vmem:[%s1916_s9 + $0xd8] sm:$0xff] }
  0x7c   : > { %831 = vmatmul.f32.vlgmr.msra.gmra.mxu1 %v2265_v40  ;;  %942 = vmatpush.msrb.mxu0 %v2396_v57  ;;  %v1008_v33 = vand.u32 4294901760, %v1007_v27  ;;  %v2564_v27 = vand.u32 4294901760, %v270_v4  ;;  %v2634_v55 = vand.u32 4294901760, %v250_v7 }
  0x7d   : > { %979 = vmatpush.msrb.mxu1 %v978_v6  ;;  %1073 = vmatpush.msrb.mxu2 %v2406_v31  ;;  %v1002_v36 = vand.u32 4294901760, %v1001_v39  ;;  %v2543_v6 = vsub.f32 %v229_v10, %v2518_v17  ;;  %v2559_v39 = vsub.f32 %v301_v63, %v2533_v38  ;;  %v1026_v10 = vand.u32 4294901760, %v1025_v58  ;;  %v262_v63 = vld [vmem:[%s1916_s9 + $0x138] sm:$0xff] }
  0x7e   : > { %1118 = vmatpush.msrb.mxu3 %v2374_v35  ;;  %944 = vmatpush.msrb.mxu0 %v2408_v42  ;;  %v258_v58 = vld [vmem:[%s1916_s9 + $0x118] sm:$0xff]  ;;  %v2589_v2 = vsub.f32 %v270_v4, %v2564_v27  ;;  %v2962_v31 = vand.u32 4294901760, %v2420_v14 }
  0x7f   : > { %985 = vmatpush.msrb.mxu1 %v984_v22  ;;  %1076 = vmatpush.msrb.mxu2 %v2420_v14  ;;  %v1020_v22 = vand.u32 4294901760, %v1019_v37  ;;  %v2933_v54 = vand.u32 4294901760, %v2543_v6  ;;  %v1043_v37 = vsub.f32 %v2529_v51, %v2929_v59  ;;  %v2604_v60 = vand.u32 4294901760, %v258_v58 }
  0x80   : > { %1120 = vmatpush.msrb.mxu3 %v2385_v49  ;;  %946 = vmatpush.msrb.mxu0 %v2413_v3  ;;  %v2963_v14 = vand.u32 4294901760, %v2435_v52 }
  0x81   : > { %991 = vmatpush.msrb.mxu1 %v990_v5  ;;  %1079 = vmatpush.msrb.mxu2 %v2435_v52  ;;  %v2556_v5 = vsub.f32 %v225_v62, %v2531_v21  ;;  %v2572_v62 = vsub.f32 %v274_v56, %v2545_v46  ;;  %v1049_v59 = vsub.f32 %v2543_v6, %v2933_v54  ;;  %v2964_v52 = vand.u32 4294901760, %v2440_v28 }
  0x82   : > { %1122 = vmatpush.msrb.mxu3 %v2396_v57  ;;  %948 = vmatpush.msrb.mxu0 %v2425_v32  ;;  %v2632_v20 = vsub.f32 %v258_v58, %v2604_v60 }
  0x83   : > { %997 = vmatpush.msrb.mxu1 %v996_v34  ;;  %1082 = vmatpush.msrb.mxu2 %v2440_v28  ;;  %v1037_v34 = vsub.f32 %v2516_v8, %v2930_v25  ;;  %v2936_v56 = vand.u32 4294901760, %v2556_v5  ;;  %v1297_v25 = vand.u32 4294901760, %v2572_v62  ;;  %v2965_v28 = vand.u32 4294901760, %v2454_v30 }
  0x84   : > { %1124 = vmatpush.msrb.mxu3 %v2408_v42  ;;  %950 = vmatpush.msrb.mxu0 %v2442_v50 }
  0x85   : > { %1003 = vmatpush.msrb.mxu1 %v1002_v36  ;;  %1085 = vmatpush.msrb.mxu2 %v2454_v30  ;;  %v2577_v36 = vand.u32 4294901760, %v266_v15  ;;  %v1055_v54 = vsub.f32 %v2556_v5, %v2936_v56  ;;  %v1298_v56 = vsub.f32 %v2572_v62, %v1297_v25 }
  0x86   : > { %1126 = vmatpush.msrb.mxu3 %v2413_v3  ;;  %952 = vmatpush.msrb.mxu0 %v2463_v11 }
  0x87   : > { %1009 = vmatpush.msrb.mxu1 %v1008_v33  ;;  %1088 = vmatpush.msrb.mxu2 %v2469_v47  ;;  %v1032_v33 = vand.u32 4294901760, %v1031_v19  ;;  %v1038_v19 = vand.u32 4294901760, %v1037_v34  ;;  %v2602_v4 = vsub.f32 %v266_v15, %v2577_v36  ;;  %v2941_v15 = vand.u32 4294901760, %v2589_v2 }
  0x88   : > { %1128 = vmatpush.msrb.mxu3 %v2425_v32  ;;  %954 = vmatpush.msrb.mxu0 %v2477_v12 }
  0x89   : > { %1015 = vmatpush.msrb.mxu1 %v1014_v44  ;;  %1091 = vmatpush.msrb.mxu2 %v2488_v16  ;;  %v2935_v44 = vand.u32 4294901760, %v2559_v39  ;;  %v1304_v45 = vsub.f32 %v2589_v2, %v2941_v15  ;;  %v238_v15 = vld [vmem:[%s1916_s9 + $0x78] sm:$0xff] }
  0x8a   : > { %1130 = vmatpush.msrb.mxu3 %v2442_v50  ;;  %956 = vmatpush.msrb.mxu0 %v2490_v61 }
  0x8b   : > { %1021 = vmatpush.msrb.mxu1 %v1020_v22  ;;  %1094 = vmatpush.msrb.mxu2 %v2502_v41  ;;  %v2591_v22 = vand.u32 4294901760, %v262_v63  ;;  %v1292_v34 = vsub.f32 %v2559_v39, %v2935_v44  ;;  %v1050_v44 = vand.u32 4294901760, %v1049_v59 }
  0x8c   : > { %1132 = vmatpush.msrb.mxu3 %v2463_v11  ;;  %958 = vmatpush.msrb.mxu0 %v2504_v48 }
  0x8d   : > { %1027 = vmatpush.msrb.mxu1 %v1026_v10  ;;  %1097 = vmatpush.msrb.mxu2 %v2516_v8  ;;  %v1044_v10 = vand.u32 4294901760, %v1043_v37  ;;  %v2620_v37 = vand.u32 4294901760, %v254_v0  ;;  %v1293_v59 = vand.u32 4294901760, %v1292_v34  ;;  %v2661_v34 = vand.u32 4294901760, %v242_v9 }
  0x8e   : > { %1134 = vmatpush.msrb.mxu3 %v2477_v12  ;;  %960 = vmatpush.msrb.mxu0 %v2518_v17 }
  0x8f   : > { %1033 = vmatpush.msrb.mxu1 %v1032_v33  ;;  %1100 = vmatpush.msrb.mxu2 %v2529_v51  ;;  %v2618_v33 = vsub.f32 %v262_v63, %v2591_v22  ;;  %v1309_v63 = vand.u32 4294901760, %v2602_v4  ;;  %v2646_v58 = vsub.f32 %v254_v0, %v2620_v37  ;;  %v2659_v0 = vsub.f32 %v250_v7, %v2634_v55 }
  0x90   : > { %1136 = vmatpush.msrb.mxu3 %v2490_v61  ;;  %962 = vmatpush.msrb.mxu0 %v2531_v21 }
  0x91   : > { %1039 = vmatpush.msrb.mxu1 %v1038_v19  ;;  %1103 = vmatpush.msrb.mxu2 %v2543_v6  ;;  %v1056_v19 = vand.u32 4294901760, %v1055_v54  ;;  %v1299_v54 = vand.u32 4294901760, %v1298_v56  ;;  %v1310_v43 = vsub.f32 %v2602_v4, %v1309_v63  ;;  %v2944_v56 = vand.u32 4294901760, %v2646_v58 }
  0x92   : > { %1138 = vmatpush.msrb.mxu3 %v2504_v48  ;;  %1155 = vmatpush.msra.mxu0 %v976_v29  ;;  %v2942_v29 = vand.u32 4294901760, %v2618_v33 }
  0x93   : > { %1045 = vmatpush.msrb.mxu1 %v1044_v10  ;;  %1106 = vmatpush.msrb.mxu2 %v2556_v5  ;;  %v2648_v10 = vand.u32 4294901760, %v246_v53 }
  0x94   : > { %1140 = vmatpush.msrb.mxu3 %v2518_v17  ;;  %1159 = vmatpush.msra.mxu0 %v982_v13  ;;  %v2943_v13 = vand.u32 4294901760, %v2632_v20 }
  0x95   : > { %1251 = vmatpush.msra.mxu2 %v2533_v38  ;;  %1051 = vmatpush.msrb.mxu1 %v1050_v44  ;;  %v1316_v44 = vsub.f32 %v2618_v33, %v2942_v29  ;;  %v2672_v7 = vsub.f32 %v246_v53, %v2648_v10  ;;  %v1333_v53 = vand.u32 4294901760, %v2659_v0  ;;  %v2686_v29 = vsub.f32 %v242_v9, %v2661_v34  ;;  %v226_v9 = vld [vmem:[%s1916_s9 + $0x18] sm:$0xff] }
  0x96   : > { %1142 = vmatpush.msrb.mxu3 %v2531_v21  ;;  %1163 = vmatpush.msra.mxu0 %v988_v1  ;;  %v1305_v1 = vand.u32 4294901760, %v1304_v45  ;;  %v1311_v45 = vand.u32 4294901760, %v1310_v43  ;;  %v1328_v43 = vsub.f32 %v2646_v58, %v2944_v56 }
  0x97   : > { %1253 = vmatpush.msra.mxu2 %v2545_v46  ;;  %1057 = vmatpush.msrb.mxu1 %v1056_v19  ;;  %v234_v19 = vld [vmem:[%s1916_s9 + $0x58] sm:$0xff] }
  0x98   : > { %1294 = vmatpush.msra.mxu3 %v1293_v59  ;;  %1167 = vmatpush.msra.mxu0 %v2962_v31  ;;  %v2676_v59 = vand.u32 4294901760, %v238_v15  ;;  %v1322_v31 = vsub.f32 %v2632_v20, %v2943_v13  ;;  %v2697_v13 = vand.u32 4294901760, %v234_v19 }
  0x99   : > { %1216 = vmatpush.msra.mxu1 %v2366_v24  ;;  %1255 = vmatpush.msra.mxu2 %v2564_v27  ;;  %v230_v24 = vld [vmem:[%s1916_s9 + $0x38] sm:$0xff]  ;;  %s1648_s9 = sshll.u32 %s217_s8, 4  ;;  %s1649_s9 = int_to_ptr.vmem [resolvable:$true] %s1648_s9 }
  0x9a   : > { %1300 = vmatpush.msra.mxu3 %v1299_v54  ;;  %1171 = vmatpush.msra.mxu0 %v2963_v14  ;;  %v1317_v54 = vand.u32 4294901760, %v1316_v44  ;;  %v1339_v14 = vand.u32 4294901760, %v2672_v7  ;;  %v1334_v44 = vsub.f32 %v2659_v0, %v1333_v53  ;;  %v2711_v56 = vand.u32 4294901760, %v230_v24 }
  0x9b   : > { %1218 = vmatpush.msra.mxu1 %v2374_v35  ;;  %1257 = vmatpush.msra.mxu2 %v2577_v36  ;;  %v2702_v35 = vsub.f32 %v238_v15, %v2676_v59  ;;  %v1329_v15 = vand.u32 4294901760, %v1328_v43 }
  0x9c   : > { %1306 = vmatpush.msra.mxu3 %v1305_v1  ;;  %1175 = vmatpush.msra.mxu0 %v2964_v52  ;;  %v1323_v1 = vand.u32 4294901760, %v1322_v31  ;;  %v1345_v52 = vand.u32 4294901760, %v2686_v29  ;;  %v1340_v30 = vsub.f32 %v2672_v7, %v1339_v14  ;;  %v2723_v31 = vand.u32 4294901760, %v226_v9 }
  0x9d   : > { %1220 = vmatpush.msra.mxu1 %v2385_v49  ;;  %1259 = vmatpush.msra.mxu2 %v2591_v22  ;;  %v2966_v49 = vand.u32 4294901760, %v2469_v47  ;;  %v2967_v47 = vand.u32 4294901760, %v2488_v16 }
  0x9e   : > { %1312 = vmatpush.msra.mxu3 %v1311_v45  ;;  %1179 = vmatpush.msra.mxu0 %v2965_v28  ;;  %v2721_v45 = vsub.f32 %v234_v19, %v2697_v13  ;;  %v1346_v43 = vsub.f32 %v2686_v29, %v1345_v52  ;;  %v2734_v19 = vsub.f32 %v230_v24, %v2711_v56  ;;  %v1341_v28 = vand.u32 4294901760, %v1340_v30 }
  0x9f   : > { %1222 = vmatpush.msra.mxu1 %v2396_v57  ;;  %1261 = vmatpush.msra.mxu2 %v2604_v60  ;;  %v1351_v57 = vand.u32 4294901760, %v2702_v35  ;;  %v2969_v24 = vand.u32 4294901760, %v2516_v8  ;;  %v2972_v30 = vand.u32 4294901760, %v2556_v5 }
  0xa0   : > { %1318 = vmatpush.msra.mxu3 %v1317_v54  ;;  %1183 = vmatpush.msra.mxu0 %v2966_v49  ;;  %v1335_v54 = vand.u32 4294901760, %v1334_v44  ;;  %v1357_v16 = vand.u32 4294901760, %v2721_v45  ;;  %v1363_v44 = vand.u32 4294901760, %v2734_v19  ;;  %v2970_v49 = vand.u32 4294901760, %v2529_v51 }
  0xa1   : > { %1224 = vmatpush.msra.mxu1 %v2408_v42  ;;  %1263 = vmatpush.msra.mxu2 %v2620_v37  ;;  %v2968_v42 = vand.u32 4294901760, %v2502_v41  ;;  %v1347_v41 = vand.u32 4294901760, %v1346_v43 }
  0xa2   : > { %1324 = vmatpush.msra.mxu3 %v1323_v1  ;;  %1187 = vmatpush.msra.mxu0 %v2967_v47  ;;  %v2742_v1 = vsub.f32 %v226_v9, %v2723_v31 }
  0xa3   : > { %1226 = vmatpush.msra.mxu1 %v2413_v3  ;;  %1265 = vmatpush.msra.mxu2 %v2634_v55  ;;  %v1352_v3 = vsub.f32 %v2702_v35, %v1351_v57 }
  0xa4   : > { %1330 = vmatpush.msra.mxu3 %v1329_v15  ;;  %1191 = vmatpush.msra.mxu0 %v2968_v42  ;;  %v1369_v9 = vand.u32 4294901760, %v2742_v1  ;;  %v2971_v15 = vand.u32 4294901760, %v2543_v6  ;;  %v2973_v6 = vand.u32 4294901760, %v2559_v39 }
  0xa5   : > { %1228 = vmatpush.msra.mxu1 %v2425_v32  ;;  %1267 = vmatpush.msra.mxu2 %v2648_v10  ;;  %v1358_v32 = vsub.f32 %v2721_v45, %v1357_v16  ;;  %v1353_v8 = vand.u32 4294901760, %v1352_v3 }
  0xa6   : > { %1336 = vmatpush.msra.mxu3 %v1335_v54  ;;  %1195 = vmatpush.msra.mxu0 %v2969_v24 }
  0xa7   : > { %1230 = vmatpush.msra.mxu1 %v2442_v50  ;;  %1269 = vmatpush.msra.mxu2 %v2661_v34  ;;  %v1364_v50 = vsub.f32 %v2734_v19, %v1363_v44  ;;  %v1359_v51 = vand.u32 4294901760, %v1358_v32 }
  0xa8   : > { %1342 = vmatpush.msra.mxu3 %v1341_v28  ;;  %1109 = vmatmul.f32.vlgmr.msrb.gmra.mxu2 %v2241_v23 }
  0xa9   : > { %1199 = vmatpush.msra.mxu0 %v2970_v49  ;;  %1232 = vmatpush.msra.mxu1 %v2463_v11  ;;  %v1370_v11 = vsub.f32 %v2742_v1, %v1369_v9  ;;  %v1365_v47 = vand.u32 4294901760, %v1364_v50 }
  0xaa   : > { %1271 = vmatpush.msra.mxu2 %v2676_v59  ;;  %1348 = vmatpush.msra.mxu3 %v1347_v41 }
  0xab   : > { %968 = vmatmul.f32.vlgmr.msrb.gmra.mxu0 %v2299_v18  ;;  %1146 = vmatmul.f32.vlgmr.msrb.gmra.mxu3 %v2265_v40 }
  0xac   : > { %1203 = vmatpush.msra.mxu0 %v2971_v15  ;;  %1234 = vmatpush.msra.mxu1 %v2477_v12  ;;  %v1371_v12 = vand.u32 4294901760, %v1370_v11 }
  0xad   : > { %1273 = vmatpush.msra.mxu2 %v2697_v13  ;;  %1354 = vmatpush.msra.mxu3 %v1353_v8 }
  0xae   : > { %1059 = vmatmul.f32.vlgmr.msrb.gmra.mxu1 %v2213_v26  ;;  %1207 = vmatpush.msra.mxu0 %v2972_v30 }
  0xaf   : > { %1236 = vmatpush.msra.mxu1 %v2490_v61  ;;  %1275 = vmatpush.msra.mxu2 %v2711_v56  ;;  %v2974_v61 = vand.u32 4294901760, %v2589_v2 }
  0xb0   : > { %1360 = vmatpush.msra.mxu3 %v1359_v51  ;;  %1382 = vmatpush.msrb.mxu0 %v2559_v39 }
  0xb1   : > { %1238 = vmatpush.msra.mxu1 %v2504_v48  ;;  %1277 = vmatpush.msra.mxu2 %v2723_v31  ;;  %v2975_v48 = vand.u32 4294901760, %v2618_v33 }
  0xb2   : > { %1366 = vmatpush.msra.mxu3 %v1365_v47  ;;  %1385 = vmatpush.msrb.mxu0 %v2572_v62 }
  0xb3   : > { %1470 = vmatpush.msrb.mxu2 %v2973_v6  ;;  %1240 = vmatpush.msra.mxu1 %v2518_v17  ;;  %v2977_v17 = vand.u32 4294901760, %v2646_v58 }
  0xb4   : > { %1372 = vmatpush.msra.mxu3 %v1371_v12  ;;  %1209 = vmatmul.f32.vlgmr.msra.gmra.mxu0 %v2213_v26 }
  0xb5   : > { %1388 = vmatpush.msrb.mxu0 %v2589_v2  ;;  %1474 = vmatpush.msrb.mxu2 %v1297_v25  ;;  %v2976_v2 = vand.u32 4294901760, %v2632_v20 }
  0xb6   : > { %1531 = vmatpush.msrb.mxu3 %v2533_v38  ;;  %1242 = vmatpush.msra.mxu1 %v2531_v21 }
  0xb7   : > { %1244 = vmatmul.f32.vlgmr.msra.gmra.mxu1 %v2213_v26  ;;  %1391 = vmatpush.msrb.mxu0 %v2602_v4 }
  0xb8   : > { %1431 = vmatpush.msrb.mxu1 %v2533_v38  ;;  %1478 = vmatpush.msrb.mxu2 %v2974_v61 }
  0xb9   : > { %1533 = vmatpush.msrb.mxu3 %v2545_v46  ;;  %1394 = vmatpush.msrb.mxu0 %v2618_v33 }
  0xba   : > { %1433 = vmatpush.msrb.mxu1 %v2545_v46  ;;  %1482 = vmatpush.msrb.mxu2 %v1309_v63 }
  0xbb   : > { %1535 = vmatpush.msrb.mxu3 %v2564_v27  ;;  %1397 = vmatpush.msrb.mxu0 %v2632_v20 }
  0xbc   : > { %1435 = vmatpush.msrb.mxu1 %v2564_v27  ;;  %1486 = vmatpush.msrb.mxu2 %v2975_v48  ;;  %v1608_v48 = vld [vmem:[%s2910_s4] sm:$0xff] }
  0xbd   : > { %1537 = vmatpush.msrb.mxu3 %v2577_v36  ;;  %1400 = vmatpush.msrb.mxu0 %v2646_v58 }
  0xbe   : > { %1437 = vmatpush.msrb.mxu1 %v2577_v36  ;;  %1490 = vmatpush.msrb.mxu2 %v2976_v2 }
  0xbf   : > { %1539 = vmatpush.msrb.mxu3 %v2591_v22  ;;  %1403 = vmatpush.msrb.mxu0 %v2659_v0  ;;  %v430_v20 = vpop.f32.mrf.mxu1 }
  0xc0   : > { %1439 = vmatpush.msrb.mxu1 %v2591_v22  ;;  %1494 = vmatpush.msrb.mxu2 %v2977_v17 }
  0xc1   : > { %1541 = vmatpush.msrb.mxu3 %v2604_v60  ;;  %1406 = vmatpush.msrb.mxu0 %v2672_v7 }
  0xc2   : > { %1441 = vmatpush.msrb.mxu1 %v2604_v60  ;;  %1498 = vmatpush.msrb.mxu2 %v1333_v53 }
  0xc3   : > { %1543 = vmatpush.msrb.mxu3 %v2620_v37  ;;  %1283 = vmatmul.f32.vlgmr.msra.gmra.mxu2 %v2299_v18  ;;  %v2978_v18 = vmov 0  }
  0xc4   : > { %1409 = vmatpush.msrb.mxu0 %v2686_v29  ;;  %1443 = vmatpush.msrb.mxu1 %v2620_v37 }
  0xc5   : > { %1502 = vmatpush.msrb.mxu2 %v1339_v14  ;;  %1545 = vmatpush.msrb.mxu3 %v2634_v55 }
  0xc6   : > { %1374 = vmatmul.f32.vlgmr.msra.gmra.mxu3 %v2213_v26  ;;  %1412 = vmatpush.msrb.mxu0 %v2702_v35 }
  0xc7   : > { %1445 = vmatpush.msrb.mxu1 %v2634_v55  ;;  %1506 = vmatpush.msrb.mxu2 %v1345_v52 }
  0xc8   : > { %1547 = vmatpush.msrb.mxu3 %v2648_v10  ;;  %1415 = vmatpush.msrb.mxu0 %v2721_v45 }
  0xc9   : > { %1447 = vmatpush.msrb.mxu1 %v2648_v10  ;;  %1510 = vmatpush.msrb.mxu2 %v1351_v57 }
  0xca   : > { %1549 = vmatpush.msrb.mxu3 %v2661_v34  ;;  %1418 = vmatpush.msrb.mxu0 %v2734_v19 }
  0xcb   : > { %1449 = vmatpush.msrb.mxu1 %v2661_v34  ;;  %1514 = vmatpush.msrb.mxu2 %v1357_v16 }
  0xcc   : > { %1551 = vmatpush.msrb.mxu3 %v2676_v59  ;;  %1421 = vmatpush.msrb.mxu0 %v2742_v1 }
  0xcd   : > { %1451 = vmatpush.msrb.mxu1 %v2676_v59  ;;  %1518 = vmatpush.msrb.mxu2 %v1363_v44 }
  0xce   : > { %1553 = vmatpush.msrb.mxu3 %v2697_v13  ;;  %1424 = vmatmul.f32.vlgmr.msrb.gmra.mxu0 %v2241_v23 }
  0xcf   : > { %1453 = vmatpush.msrb.mxu1 %v2697_v13  ;;  %1522 = vmatpush.msrb.mxu2 %v1369_v9  ;;  %v339_v23 = vpop.f32.mrf.mxu0 }
  0xd0   : > { %1555 = vmatpush.msrb.mxu3 %v2711_v56  ;;  %1524 = vmatmul.f32.vlgmr.msrb.gmra.mxu2 %v2213_v26 }
  0xd1   : > { %1455 = vmatpush.msrb.mxu1 %v2711_v56  ;;  %1764 = vset.pattern.permute.xlu1 %v2978_v18 }
  0xd2   : > { %1557 = vmatpush.msrb.mxu3 %v2723_v31  ;;  %1765 = vset.pattern.permute.xlu2 %v2978_v18 }
  0xd3   : > { %1559 = vmatmul.f32.vlgmr.msrb.gmra.mxu3 %v2213_v26  ;;  %1457 = vmatpush.msrb.mxu1 %v2723_v31 }
  0xd4   : > { %1461 = vmatmul.f32.vlgmr.msrb.gmra.mxu1 %v2265_v40  ;;  %1611 = vperm.xlu2 %1765, %v1608_v48  }
  0xd9   : > { %v480_v55 = vpop.f32.mrf.mxu2  ;;  %v284_v22 = vpop.permute.xlu0 %283 }
  0xda   : > { %v340_v33 = vadd.f32 %v339_v23, %v284_v22 }
  0xdb   : > { %v517_v60 = vpop.f32.mrf.mxu3 }
  0xdc   : > { %v431_v58 = vadd.f32 %v430_v20, %v340_v33  ;;  %v1598_v20 = vld [vmem:[%s2909_s3] sm:$0xff] }
  0xde   : > { %v580_v21 = vpop.f32.mrf.mxu0  ;;  %v481_v56 = vadd.f32 %v480_v55, %v431_v58 }
  0xe0   : > { %v518_v52 = vadd.f32 %v517_v60, %v481_v56 }
  0xe1   : > { %v615_v25 = vpop.f32.mrf.mxu1 }
  0xe2   : > { %v581_v43 = vadd.f32 %v580_v21, %v518_v52 }
  0xe4   : > { %v616_v3 = vadd.f32 %v615_v25, %v581_v43 }
  0xf0   : > { %v654_v38 = vpop.f32.mrf.mxu2 }
  0xf1   : > { %v655_v4 = vadd.f32 %v654_v38, %v284_v22 }
  0xf3   : > { %v745_v46 = vpop.f32.mrf.mxu3 }
  0xf4   : > { %v746_v40 = vadd.f32 %v745_v46, %v655_v4 }
  0xf6   : > { %v795_v5 = vpop.f32.mrf.mxu0 }
  0xf7   : > { %v796_v13 = vadd.f32 %v795_v5, %v746_v40 }
  0xf9   : > { %v895_v39 = vpop.f32.mrf.mxu2  ;;  %v832_v27 = vpop.f32.mrf.mxu1 }
  0xfa   : > { %v833_v53 = vadd.f32 %v832_v27, %v796_v13 }
  0xfc   : > { %v930_v62 = vpop.f32.mrf.mxu3  ;;  %v896_v57 = vadd.f32 %v895_v39, %v833_v53 }
  0xfe   : > { %v931_v28 = vadd.f32 %v930_v62, %v896_v57 }
 0x100   : > { %v1563_v32 = vadd.f32 %v931_v28, %v616_v3 }
 0x128   : > { %v969_v36 = vpop.f32.mrf.mxu0 }
 0x129   : > { %v970_v37 = vadd.f32 %v969_v36, %v284_v22 }
 0x12b   : > { %v1110_v26 = vpop.f32.mrf.mxu2  ;;  %v1060_v63 = vpop.f32.mrf.mxu1 }
 0x12c   : > { %v1061_v10 = vadd.f32 %v1060_v63, %v970_v37 }
 0x12e   : > { %v1147_v29 = vpop.f32.mrf.mxu3  ;;  %v1111_v7 = vadd.f32 %v1110_v26, %v1061_v10  ;;  %v1612_v63 = vpop.permute.xlu2 %1611 }
 0x130   : > { %v1148_v45 = vadd.f32 %v1147_v29, %v1111_v7 }
 0x131   : > { %v1210_v0 = vpop.f32.mrf.mxu0 }
 0x132   : > { %v1211_v19 = vadd.f32 %v1210_v0, %v1148_v45 }
 0x134   : > { %v1245_v14 = vpop.f32.mrf.mxu1 }
 0x135   : > { %v1246_v24 = vadd.f32 %v1245_v14, %v1211_v19 }
 0x137   : > { %v1564_v49 = vadd.f32 %v1563_v32, %v1246_v24 }
 0x146   : > { %v1284_v34 = vpop.f32.mrf.mxu2 }
 0x147   : > { %v1285_v59 = vadd.f32 %v1284_v34, %v284_v22 }
 0x149   : > { %v1375_v35 = vpop.f32.mrf.mxu3 }
 0x14a   : > { %v1376_v31 = vadd.f32 %v1375_v35, %v1285_v59 }
 0x14b   : > { %v1425_v54 = vpop.f32.mrf.mxu0 }
 0x14c   : > { %v1426_v42 = vadd.f32 %v1425_v54, %v1376_v31 }
 0x151   : > { %v1462_v16 = vpop.f32.mrf.mxu1 }
 0x152   : > { %v1463_v1 = vadd.f32 %v1462_v16, %v1426_v42 }
 0x153   : > { %v1525_v41 = vpop.f32.mrf.mxu2 }
 0x154   : > { %v1526_v44 = vadd.f32 %v1525_v41, %v1463_v1 }
 0x156   : > { %v1560_v9 = vpop.f32.mrf.mxu3 }
 0x157   : > { %v1561_v8 = vadd.f32 %v1560_v9, %v1526_v44 }
 0x159   : > { %v1565_v50 = vadd.f32 %v1564_v49, %v1561_v8 }
 0x15b   : > { %1566 = vadd.xlane.f32.xlu0 %v1565_v50 }
 0x1ce   : > { %v1567_v15 = vpop.xlane.xlu0 %1566 }
 0x1cf   : > { %v1568_v51 = vmul.f32 0.001953125, %v1567_v15 }
 0x1d1   : > { %v1569_v11 = vsub.f32 %v616_v3, %v1568_v51  ;;  %v1570_v30 = vsub.f32 %v931_v28, %v1568_v51  ;;  %v1571_v47 = vsub.f32 %v1246_v24, %v1568_v51  ;;  %v1572_v12 = vsub.f32 %v1561_v8, %v1568_v51 }
 0x1d3   : > { %v1573_v6 = vmul.f32 %v1569_v11, %v1569_v11  ;;  %v1574_v61 = vmul.f32 %v1570_v30, %v1570_v30  ;;  %v1575_v2 = vmul.f32 %v1571_v47, %v1571_v47  ;;  %v1576_v18 = vmul.f32 %v1572_v12, %v1572_v12 }
 0x1d5   : > { %v1577_v17 = vadd.f32 %v1574_v61, %v1573_v6 }
 0x1d7   : > { %v1578_v23 = vadd.f32 %v1577_v17, %v1575_v2 }
 0x1d9   : > { %v1579_v55 = vadd.f32 %v1578_v23, %v1576_v18 }
 0x1db   : > { %1580 = vadd.xlane.f32.xlu1 %v1579_v55 }
 0x1f4   : > { %1601 = vperm.xlu1 %1764, %v1598_v20  }
 0x24e   : > { %v1581_v60 = vpop.xlane.xlu1 %1580 }
 0x24f   : > { %v1582_v21 = vmul.f32 0.001953125, %v1581_v60 }
 0x251   : > { %v1583_v38 = vadd.f32 1e-05, %v1582_v21 }
 0x253   : > { %1766 = vrsqrt.f32 %v1583_v38  ;;  %vm1590_vm3 = vweird.f32 %v1583_v38 }
 0x259   : > { %v1767_v25 = vpop.eup %1766 }
 0x25a   : > { %v1585_v46 = vmul.f32 %v1767_v25, %v1583_v38  ;;  %vm1591_vm2 = vweird.f32 %v1767_v25 }
 0x25b   : > { %vm1592_vm4 = vmor %vm1590_vm3, %vm1591_vm2 }
 0x25c   : > { %v1586_v5 = vmul.f32 %v1767_v25, %v1585_v46 }
 0x25e   : > { %v1587_v39 = vmul.f32 0.5, %v1586_v5 }
 0x260   : > { %v1588_v27 = vsub.f32 1.5, %v1587_v39 }
 0x262   : > { %v1589_v62 = vmul.f32 %v1767_v25, %v1588_v27 }
 0x264   : > { %v1593_v36 = vsel %vm1592_vm4, %v1767_v25, %v1589_v62 }
 0x265   : > { %v1594_v22 = vmul.f32 %v1593_v36, %v1569_v11  ;;  %v1595_v4 = vmul.f32 %v1593_v36, %v1570_v30  ;;  %v1596_v26 = vmul.f32 %v1593_v36, %v1571_v47  ;;  %v1597_v33 = vmul.f32 %v1593_v36, %v1572_v12 }
 0x266   : > { %v1602_v37 = vpop.permute.xlu1 %1601 }
 0x267   : > { %v1604_v40 = vmul.f32 %v1602_v37, %v1594_v22  ;;  %v1605_v29 = vmul.f32 %v1602_v37, %v1595_v4  ;;  %v1606_v58 = vmul.f32 %v1602_v37, %v1596_v26  ;;  %v1607_v10 = vmul.f32 %v1602_v37, %v1597_v33 }
 0x269   : > { %v1614_v13 = vadd.f32 %v1612_v63, %v1604_v40  ;;  %v1615_v0 = vadd.f32 %v1612_v63, %v1605_v29  ;;  %v1616_v34 = vadd.f32 %v1612_v63, %v1606_v58  ;;  %v1617_v56 = vadd.f32 %v1612_v63, %v1607_v10 }
 0x26b   : > { %vm1618_vm5 = vcmp.ge.f32.partialorder %v1614_v13, 0.0  ;;  %vm1619_vm6 = vcmp.ge.f32.partialorder %v1615_v0, 0.0  ;;  %vm1620_vm7 = vcmp.ge.f32.partialorder %v1616_v34, 0.0  ;;  %vm1621_vm8 = vcmp.ge.f32.partialorder %v1617_v56, 0.0 }
 0x26c   : > { %v1622_v7 = vmul.f32 0.01, %v1614_v13  ;;  %v1623_v59 = vmul.f32 0.01, %v1615_v0  ;;  %v1624_v53 = vmul.f32 0.01, %v1616_v34 }
 0x26d   : > { %v1625_v14 = vmul.f32 0.01, %v1617_v56 }
 0x26e   : > { %v1626_v35 = vsel %vm1618_vm5, %v1614_v13, %v1622_v7  ;;  %v1627_v52 = vsel %vm1619_vm6, %v1615_v0, %v1623_v59  ;;  %v1628_v45 = vsel %vm1620_vm7, %v1616_v34, %v1624_v53 }
 0x26f   : > { %v1629_v31 = vsel %vm1621_vm8, %v1617_v56, %v1625_v14  ;;  %1630 = vst [vmem:[%s217_s8] sm:$0xff] %v1626_v35 }
 0x270   : > { %1631 = vst [vmem:[%s217_s8 + $0x8] sm:$0xff] %v1627_v52 }
 0x271   : > { %1632 = vst [vmem:[%s217_s8 + $0x10] sm:$0xff] %v1628_v45 }
 0x272   : > { %1633 = vst [vmem:[%s217_s8 + $0x18] sm:$0xff] %v1629_v31 }
 0x273   : > { %1795 = shalt.err (!%p1792_p3)
}
 0x274   : > { %1723 = dma.vmem_to_hbm [thread:$0]  (%p1901_p5), %s1649_s9, 512, %s1651_s22, %s1635_s10  }
 0x275 PF: > { %p1729_p4 = scmp.ge.s32.totalorder %s1830_s21, 2  ;;  %s1662_s23 = sand.u32 1, %s1818_s18  }
 0x276   : > { %s1663_s25 = scalar_lea.sflag [#allocation3], %s1662_s23 }
 0x277   : > { %p1726_p7 = pnand %p1729_p4, %p1905_p6 }
 0x279   : > { %p1727_p8 = pneg %p1726_p7 }
 0x27b   : > { %1813 = dma.done.wait (%p1727_p8), %s1663_s25, 512  }
 0x27c   : > { %1815 = vsyncadd (%p1727_p8), %s1663_s25, 4294966784  ;;  %p15_p9 = scmp.ge.s32.totalorder %s1888_s24, 4   ;;  %s2979_s18 = smov %s1822_s19 }
 0x27d   : > { %s2980_s19 = smov %s1826_s20  ;;  %s2981_s20 = smov %s1899_s27 }
 0x27e   : > { %s2982_s21 = smov %s1888_s24  ;;  %17 = sbr.rel (!%p15_p9) target bundleno = 3 (0x3), region = 75 }
 0x283   :  { %1669 = vsyncpa [#allocation3], 1 }
 0x284   :  { %1671 = vsyncpa [#allocation3 + $0x1], 1 }

</bundles_post_ra>
